<compile_context>
chip_gen: v7x
topology: tpu7x:2x2x1
jax: 0.10.0
libtpu: 0.0.40
codegen_flags: <defaults>
</compile_context>

<pallas_src>
import jax
import jax.numpy as jnp
from jax.experimental import pallas as pl
from jax.experimental.pallas import tpu as pltpu


def _upsample_kernel(wt_ref, xt_ref, ot_ref):
    """ot (l_out, TM) = wt (l_out, l_in) @ xt (l_in, TM) on the MXU."""
    xt = xt_ref[...]
    if xt.dtype != jnp.float32:
        # Keep interpolation weights and accumulation in f32.
        xt = xt.astype(jnp.float32)
    ot_ref[...] = jnp.dot(
        wt_ref[...], xt, preferred_element_type=jnp.float32
    ).astype(ot_ref.dtype)


def _build_linear_weights_t(l_in: int, l_out: int) -> jax.Array:
    """W^T (l_out, l_in) in float32, align_corners=True linear interpolation."""
    if l_out == 1:
        pos = jnp.zeros((1,), jnp.float32)
    else:
        pos = jnp.arange(l_out, dtype=jnp.float32) * ((l_in - 1) / (l_out - 1))
    lo = jnp.clip(jnp.floor(pos).astype(jnp.int32), 0, l_in - 1)
    hi = jnp.minimum(lo + 1, l_in - 1)
    frac = pos - lo.astype(jnp.float32)
    cols = jnp.arange(l_in, dtype=jnp.int32)[None, :]            # (1, l_in)
    w = (jnp.where(cols == lo[:, None], 1.0 - frac[:, None], 0.0)
         + jnp.where(cols == hi[:, None], frac[:, None], 0.0))
    return w.astype(jnp.float32)                                 # (l_out, l_in)


def _choose_tile_m(m, l_in, l_out, itemsize, vmem_budget_bytes=16 * 1024 * 1024):
    """Lane-axis (M) tile: largest 128-multiple that fits the VMEM budget."""
    if m <= 512:
        return m                    # full dim is always a legal block size
    w_bytes = 2 * l_in * l_out * 4              # W^T (worst-case double buffer)
    per_col = 2 * (l_in + l_out) * itemsize     # double-buffered in + out column
    tm = (vmem_budget_bytes - w_bytes) // max(per_col, 1)
    tm = int(max(128, min(2048, (tm // 128) * 128)))
    return min(tm, (m // 128) * 128)


def upsample_linear(x: jax.Array, factor: int = 2) -> jax.Array:
    """(N, C, L) -> (N, C, L*factor); matches nn.Upsample(mode='linear',
    align_corners=True, scale_factor=factor)."""
    n, c, l_in = x.shape
    l_out = l_in * factor
    m = n * c
    itemsize = jnp.dtype(x.dtype).itemsize

    wt = _build_linear_weights_t(l_in, l_out)        # (l_out, l_in) f32
    xt = x.reshape(m, l_in).T                        # (l_in, M): M on lanes

    tm = _choose_tile_m(m, l_in, l_out, itemsize)
    grid = (pl.cdiv(m, tm),)

    cost = pl.CostEstimate(
        flops=2 * m * l_in * l_out,
        transcendentals=0,
        bytes_accessed=(m * l_in + m * l_out) * itemsize + l_in * l_out * 4,
    )

    out_t = pl.pallas_call(
        _upsample_kernel,
        out_shape=jax.ShapeDtypeStruct((l_out, m), x.dtype),
        grid_spec=pl.GridSpec(
            grid=grid,
            in_specs=[
                # W^T: constant block index -> DMA'd once, stays resident.
                pl.BlockSpec((l_out, l_in), lambda i: (0, 0)),
                # x^T tile: the lane axis M is tiled across the grid.
                pl.BlockSpec((l_in, tm), lambda i: (0, i)),
            ],
            out_specs=pl.BlockSpec((l_out, tm), lambda i: (0, i)),
        ),
        compiler_params=pltpu.CompilerParams(
            dimension_semantics=("parallel",),
            vmem_limit_bytes=32 * 1024 * 1024,
        ),
        cost_estimate=cost,
    )(wt, xt)

    return out_t.T.reshape(n, c, l_out)


def _reference_upsample(x: jax.Array, factor: int = 2) -> jax.Array:
    """Plain-JAX reference of linear, align_corners=True upsample."""
    n, c, l_in = x.shape
    l_out = l_in * factor
    pos = jnp.arange(l_out, dtype=jnp.float32) * ((l_in - 1) / max(l_out - 1, 1))
    lo = jnp.clip(jnp.floor(pos).astype(jnp.int32), 0, l_in - 1)
    hi = jnp.minimum(lo + 1, l_in - 1)
    frac = (pos - lo.astype(jnp.float32)).astype(x.dtype)
    xl = jnp.take(x, lo, axis=-1)
    xh = jnp.take(x, hi, axis=-1)
    return xl * (1 - frac) + xh * frac


if __name__ == "__main__":
    key = jax.random.PRNGKey(0)
    k1, k2 = jax.random.split(key)

    # nn.Upsample(mode='linear') requires 3-D (N, C, L) input.
    x = jax.random.normal(k1, (2, 4, 16), dtype=jnp.float32)
    out = jax.block_until_ready(upsample_linear(x, factor=2))
    ref = _reference_upsample(x, factor=2)
    assert out.shape == (2, 4, 32), out.shape
    assert jnp.allclose(out, ref, atol=1e-5, rtol=1e-5), "mismatch vs reference"

    # Larger batch to exercise the tiled, multi-grid-step, lane-dense path
    # (M = 2560 -> tile 2048, grid of 2 with a partial final block).
    x2 = jax.random.normal(k2, (32, 80, 16), dtype=jnp.float32)
    out2 = jax.block_until_ready(upsample_linear(x2, factor=2))
    ref2 = _reference_upsample(x2, factor=2)
    assert out2.shape == (32, 80, 32), out2.shape
    assert jnp.allclose(out2, ref2, atol=1e-5, rtol=1e-5), "mismatch (tiled path)"

    print("KERNEL_OK")
</pallas_src>

<mosaic_0001>
module attributes {stable_mosaic.version = 11 : i64} {
  func.func @_upsample_kernel(%arg0: i32, %arg1: memref<32x16xf32, #tpu.memory_space<vmem>>, %arg2: memref<16x8xf32, #tpu.memory_space<vmem>>, %arg3: memref<32x8xf32, #tpu.memory_space<vmem>>) attributes {dimension_semantics = [#tpu.dimension_semantics<parallel>], iteration_bounds = array<i64: 1>, scalar_prefetch = 0 : i64, scratch_operands = 0 : i64, tpu.core_type = #tpu.core_type<tc>, window_params = [{pipeline_mode = #tpu.pipeline_mode<synchronous>, transform_indices = @transform_0, window_bounds = array<i64: 32, 16>}, {transform_indices = @transform_1, window_bounds = array<i64: 16, 8>}, {transform_indices = @transform_2, window_bounds = array<i64: 32, 8>}]} {
    %c0 = arith.constant 0 : index
    %c0_0 = arith.constant 0 : index
    %0 = vector.load %arg2[%c0, %c0_0] : memref<16x8xf32, #tpu.memory_space<vmem>>, vector<16x8xf32>
    %c0_1 = arith.constant 0 : index
    %c0_2 = arith.constant 0 : index
    %1 = vector.load %arg1[%c0_1, %c0_2] : memref<32x16xf32, #tpu.memory_space<vmem>>, vector<32x16xf32>
    %cst = arith.constant dense<0.000000e+00> : vector<32x8xf32>
    %2 = tpu.matmul %1, %0, %cst {dimension_numbers = #tpu.dot_dimension_numbers<[1], [0], [0], [1], [0, 0, 1, 1], [], []>} : vector<32x16xf32>, vector<16x8xf32>, vector<32x8xf32> -> vector<32x8xf32>
    %c0_3 = arith.constant 0 : index
    %c0_4 = arith.constant 0 : index
    %3 = vector.load %arg3[%c0_3, %c0_4] : memref<32x8xf32, #tpu.memory_space<vmem>>, vector<32x8xf32>
    tpu.vector_store %arg3[%c0_3, %c0_4], %2 {strides = array<i32>} : memref<32x8xf32, #tpu.memory_space<vmem>>, vector<32x8xf32>,
    return
  }
  func.func @transform_0(%arg0: i32) -> (i32, i32) {
    %c0_i32 = arith.constant 0 : i32
    %c0_i32_0 = arith.constant 0 : i32
    %c0_i32_1 = arith.constant 0 : i32
    return %c0_i32, %c0_i32_0 : i32, i32
  }
  func.func @transform_1(%arg0: i32) -> (i32, i32) {
    %c0_i32 = arith.constant 0 : i32
    %c0_i32_0 = arith.constant 0 : i32
    return %c0_i32, %arg0 : i32, i32
  }
  func.func @transform_2(%arg0: i32) -> (i32, i32) {
    %c0_i32 = arith.constant 0 : i32
    %c0_i32_0 = arith.constant 0 : i32
    return %c0_i32, %arg0 : i32, i32
  }
}

</mosaic_0001>

<bundles_post_ra>
// kernel: tpu_custom_call.1
= control target key start
LH: loop header
LB: loop body
LE: loop exit
PB: predicated region body
PF: predicated region fallthrough
CT: control target
= control target key end

     0   :  { %vm17_vm0 = vcmask 130048   ;;  %vm115_vm1 = vcmask 64512   ;;  %s195_s1 = inlined_call_operand.vmem [shape: f32[16,8], index: 1, kind: input, shape index: {}]   ;;  %s196_s0 = inlined_call_operand.vmem [shape: f32[32,16], index: 0, kind: input, shape index: {}]   ;;  %s197_s2 = inlined_call_operand.vmem [shape: f32[32,8], index: 2, kind: output, shape index: {}]  }
   0x1   :  { %v11_v0 = vld [vmem:[%s195_s1] sm:$0xff]  ;;  %v12_v1 = vld [vmem:[%s195_s1 + $0x8] sm:$0xff]  ;;  %v15_v4 = vld [vmem:[%s196_s0 + $0x10] sm:$0xff] }
   0x2   :  { %v13_v2 = vld [vmem:[%s196_s0] sm:$0xff]  ;;  %v144_v3 = vpack.c.bf16 %v12_v1, %v11_v0  ;;  %141 = vmatprep.mubr.msk.f32.mxu1 %vm17_vm0, %v15_v4  ;;  %v14_v5 = vld [vmem:[%s196_s0 + $0x8] sm:$0xff]  ;;  %v16_v6 = vld [vmem:[%s196_s0 + $0x18] sm:$0xff] }
   0x3   :  { %138 = vmatprep.mubr.msk.f32.mxu0 %vm17_vm0, %v13_v2 }
   0x4   :  { %145 = vmatprep.subr.bf16.mxu0 %v144_v3  ;;  %148 = vmatprep.subr.bf16.mxu1 %v144_v3 }
   0x5   :  { %147 = vmatpush3.bf16.msra.mxu0 %v144_v3  ;;  %149 = vmatpush3.bf16.msra.mxu1 %v144_v3 }
   0x8   :  { %139 = vmatmul.mubr.msk.f32.vlgmr.msra.gmra.mrb[0].mxu0 %vm17_vm0, %v14_v5  ;;  %142 = vmatmul.mubr.msk.f32.vlgmr.msra.gmra.mrb[0].mxu1 %vm17_vm0, %v16_v6 }
  0xdb   :  { %v140_v7 = vpop.f32.mrb[0].mxu0  ;;  %v143_v8 = vpop.f32.mrb[0].mxu1 }
  0xdc   :  { %117 = vst.msk [vmem:[%s197_s2 + $0x8] sm:$0xff] %vm115_vm1, %v140_v7  ;;  %119 = vst.msk [vmem:[%s197_s2 + $0x18] sm:$0xff] %vm115_vm1, %v143_v8  ;;  %v96_v9 = vpop.f32.mrb[1].mxu0  ;;  %v106_v10 = vpop.f32.mrb[1].mxu1 }
  0xdd   :  { %116 = vst.msk [vmem:[%s197_s2] sm:$0xff] %vm115_vm1, %v96_v9  ;;  %118 = vst.msk [vmem:[%s197_s2 + $0x10] sm:$0xff] %vm115_vm1, %v106_v10 }

</bundles_post_ra>
